<compile_context>
chip_gen: v5e
topology: v5e:2x2
jax: 0.10.0
libtpu: 0.0.40
codegen_flags: <defaults>
</compile_context>

<pallas_src>
import jax
import jax.numpy as jnp
from jax.experimental import pallas as pl
from jax.experimental.pallas import tpu as pltpu


def mlpp_kernel(x_ref, w1_ref, b1_ref, gamma_ref, beta_ref, w2_ref, b2_ref,
                o_ref, acc_ref):
    k = pl.program_id(0)

    @pl.when(k == 0)
    def _():
        # Fold the second bias into the accumulator init (one less VPU pass).
        acc_ref[...] = jnp.broadcast_to(
            b2_ref[...].astype(jnp.float32), acc_ref.shape)

    # ---- Linear 1, hidden tile (MXU: bf16 inputs, f32 accumulation) ----
    h = jnp.dot(x_ref[...].astype(jnp.bfloat16),
                w1_ref[...].astype(jnp.bfloat16),
                preferred_element_type=jnp.float32)
    h = h + b1_ref[...].astype(jnp.float32)                    # (B, TH)

    # ---- BatchNorm1d, training-mode batch stats (biased var, eps=1e-5).
    # Exact under hidden tiling: stats are per hidden column over the full
    # batch.  Single traversal for sum / sum-of-squares, var clamped at 0,
    # gamma/beta folded into one scale/shift, fused with ReLU.  All f32. ----
    inv_b = 1.0 / h.shape[0]
    mean = jnp.sum(h, axis=0, keepdims=True) * inv_b
    mean_sq = jnp.sum(h * h, axis=0, keepdims=True) * inv_b
    var = jnp.maximum(mean_sq - mean * mean, 0.0)
    scale = gamma_ref[...].astype(jnp.float32) * jax.lax.rsqrt(var + 1e-5)
    shift = beta_ref[...].astype(jnp.float32) - mean * scale
    h = jnp.maximum(h * scale + shift, 0.0)                    # one VPU pass

    # ---- Linear 2: accumulate this hidden tile's contribution (MXU) ----
    acc_ref[...] += jnp.dot(h.astype(jnp.bfloat16),
                            w2_ref[...].astype(jnp.bfloat16),
                            preferred_element_type=jnp.float32)

    @pl.when(k == pl.num_programs(0) - 1)
    def _():
        o_ref[...] = acc_ref[...].astype(o_ref.dtype)


def _pick_hidden_tile(ft_dim, hidden_dim, bottleneck_dim,
                      tile_budget_bytes=8 << 20):
    """Largest multiple-of-128 divisor of hidden_dim whose double-buffered
    w1/w2 tiles fit the budget (headroom for v7x's 64 MiB physical VMEM)."""
    if hidden_dim % 128 != 0:
        return hidden_dim                      # fallback: single hidden tile
    best, th = 128, 128
    while th <= hidden_dim:
        if hidden_dim % th == 0:
            tile_bytes = 2 * 4 * (ft_dim * th + th * bottleneck_dim + 3 * th)
            if tile_bytes <= tile_budget_bytes:
                best = th
            else:
                break
        th += 128
    return best


def mlpp_projector(x, w1, b1, gamma, beta, w2, b2, hidden_tile=None):
    batch, ft_dim = x.shape
    hidden_dim = w1.shape[1]
    bottleneck_dim = w2.shape[1]

    th = hidden_tile if hidden_tile is not None else _pick_hidden_tile(
        ft_dim, hidden_dim, bottleneck_dim)
    assert hidden_dim % th == 0, "hidden tile must divide hidden_dim"
    n_steps = hidden_dim // th

    # Rough VMEM footprint: double-buffered pipelined operands + output + acc.
    f32 = 4
    tile_in = (batch * ft_dim + ft_dim * th + 3 * th
               + th * bottleneck_dim + bottleneck_dim)
    vmem_bytes = (2 * (tile_in + batch * bottleneck_dim)
                  + batch * bottleneck_dim) * f32 + (2 << 20)
    vmem_bytes = int(min(max(vmem_bytes, 4 << 20), 64 << 20))

    flops = (2 * batch * ft_dim * hidden_dim
             + 2 * batch * hidden_dim * bottleneck_dim)
    bytes_accessed = f32 * (x.size + w1.size + b1.size + gamma.size
                            + beta.size + w2.size + b2.size
                            + batch * bottleneck_dim)

    grid_spec = pltpu.PrefetchScalarGridSpec(
        num_scalar_prefetch=0,
        grid=(n_steps,),
        in_specs=[
            pl.BlockSpec((batch, ft_dim), lambda k: (0, 0)),       # x resident
            pl.BlockSpec((ft_dim, th), lambda k: (0, k)),          # w1 tile
            pl.BlockSpec((1, th), lambda k: (0, k)),               # b1 tile
            pl.BlockSpec((1, th), lambda k: (0, k)),               # gamma tile
            pl.BlockSpec((1, th), lambda k: (0, k)),               # beta tile
            pl.BlockSpec((th, bottleneck_dim), lambda k: (k, 0)),  # w2 tile
            pl.BlockSpec((1, bottleneck_dim), lambda k: (0, 0)),   # b2 resident
        ],
        out_specs=pl.BlockSpec((batch, bottleneck_dim), lambda k: (0, 0)),
        scratch_shapes=[pltpu.VMEM((batch, bottleneck_dim), jnp.float32)],
    )

    return pl.pallas_call(
        mlpp_kernel,
        out_shape=jax.ShapeDtypeStruct((batch, bottleneck_dim), x.dtype),
        grid_spec=grid_spec,
        compiler_params=pltpu.CompilerParams(
            dimension_semantics=("arbitrary",),   # hidden is a reduction axis
            vmem_limit_bytes=vmem_bytes),
        cost_estimate=pl.CostEstimate(
            flops=flops, transcendentals=hidden_dim,
            bytes_accessed=bytes_accessed),
    )(x, w1, b1, gamma, beta, w2, b2)


def init_params(key, ft_dim, hidden_dim, bottleneck_dim, dtype=jnp.float32):
    k1, k2, k3, k4 = jax.random.split(key, 4)
    # PyTorch Linear default init: U(-1/sqrt(fan_in), 1/sqrt(fan_in))
    lim1 = 1.0 / jnp.sqrt(ft_dim)
    w1 = jax.random.uniform(k1, (ft_dim, hidden_dim), dtype, -lim1, lim1)
    b1 = jax.random.uniform(k2, (1, hidden_dim), dtype, -lim1, lim1)
    # BatchNorm1d default: gamma=1, beta=0
    gamma = jnp.ones((1, hidden_dim), dtype)
    beta = jnp.zeros((1, hidden_dim), dtype)
    lim2 = 1.0 / jnp.sqrt(hidden_dim)
    w2 = jax.random.uniform(k3, (hidden_dim, bottleneck_dim), dtype, -lim2, lim2)
    b2 = jax.random.uniform(k4, (1, bottleneck_dim), dtype, -lim2, lim2)
    return w1, b1, gamma, beta, w2, b2


if __name__ == "__main__":
    # Small but lane-friendly shapes (hidden/bottleneck multiples of 128,
    # batch multiple of 8) consistent with ft_dim -> hidden -> bottleneck.
    batch, ft_dim, hidden_dim, bottleneck_dim = 16, 32, 256, 128

    key = jax.random.PRNGKey(0)
    kx, kp = jax.random.split(key)
    x = jax.random.normal(kx, (batch, ft_dim), jnp.float32)
    w1, b1, gamma, beta, w2, b2 = init_params(kp, ft_dim, hidden_dim,
                                              bottleneck_dim)

    # hidden_tile=128 -> 2 grid steps, exercising the accumulator path.
    out = mlpp_projector(x, w1, b1, gamma, beta, w2, b2, hidden_tile=128)
    jax.block_until_ready(out)

    # Pure-JAX f32 reference (kernel uses bf16 MXU inputs with f32 accumulation,
    # so compare with a bf16-appropriate tolerance).
    h = x @ w1 + b1
    mean = h.mean(0, keepdims=True)
    var = ((h - mean) ** 2).mean(0, keepdims=True)
    h = gamma * (h - mean) / jnp.sqrt(var + 1e-5) + beta
    h = jnp.maximum(h, 0.0)
    ref = h @ w2 + b2
    assert jnp.allclose(out, ref, atol=2e-2, rtol=2e-2), "mismatch vs JAX reference"

    print("KERNEL_OK")
</pallas_src>

<mosaic_0001>
module attributes {stable_mosaic.version = 11 : i64} {
  func.func @mlpp_kernel(%arg0: i32, %arg1: memref<16x32xf32, #tpu.memory_space<vmem>>, %arg2: memref<32x128xf32, #tpu.memory_space<vmem>>, %arg3: memref<1x128xf32, #tpu.memory_space<vmem>>, %arg4: memref<1x128xf32, #tpu.memory_space<vmem>>, %arg5: memref<1x128xf32, #tpu.memory_space<vmem>>, %arg6: memref<128x128xf32, #tpu.memory_space<vmem>>, %arg7: memref<1x128xf32, #tpu.memory_space<vmem>>, %arg8: memref<16x128xf32, #tpu.memory_space<vmem>>, %arg9: memref<16x128xf32, #tpu.memory_space<vmem>>) attributes {dimension_semantics = [#tpu.dimension_semantics<arbitrary>], iteration_bounds = array<i64: 2>, scalar_prefetch = 0 : i64, scratch_operands = 1 : i64, tpu.core_type = #tpu.core_type<tc>, window_params = [{pipeline_mode = #tpu.pipeline_mode<synchronous>, transform_indices = @transform_0, window_bounds = array<i64: 16, 32>}, {transform_indices = @transform_1, window_bounds = array<i64: 32, 128>}, {transform_indices = @transform_2, window_bounds = array<i64: 1, 128>}, {transform_indices = @transform_3, window_bounds = array<i64: 1, 128>}, {transform_indices = @transform_4, window_bounds = array<i64: 1, 128>}, {transform_indices = @transform_5, window_bounds = array<i64: 128, 128>}, {pipeline_mode = #tpu.pipeline_mode<synchronous>, transform_indices = @transform_6, window_bounds = array<i64: 1, 128>}, {pipeline_mode = #tpu.pipeline_mode<synchronous>, transform_indices = @transform_7, window_bounds = array<i64: 16, 128>}]} {
    %c0_i32 = arith.constant 0 : i32
    %0 = arith.cmpi eq, %arg0, %c0_i32 : i32
    %1 = arith.extui %0 : i1 to i32
    %c0_i32_0 = arith.constant 0 : i32
    %2 = arith.cmpi ne, %1, %c0_i32_0 : i32
    scf.if %2 {
      %c0_25 = arith.constant 0 : index
      %c0_26 = arith.constant 0 : index
      %48 = vector.load %arg7[%c0_25, %c0_26] : memref<1x128xf32, #tpu.memory_space<vmem>>, vector<1x128xf32>
      %49 = vector.shape_cast %48 : vector<1x128xf32> to vector<1x128xf32>
      %50 = vector.broadcast %49 : vector<1x128xf32> to vector<16x128xf32>
      %c0_27 = arith.constant 0 : index
      %c0_28 = arith.constant 0 : index
      %51 = vector.load %arg9[%c0_27, %c0_28] : memref<16x128xf32, #tpu.memory_space<vmem>>, vector<16x128xf32>
      tpu.vector_store %arg9[%c0_27, %c0_28], %50 {strides = array<i32>} : memref<16x128xf32, #tpu.memory_space<vmem>>, vector<16x128xf32>,
    } else {
    }
    %c0 = arith.constant 0 : index
    %c0_1 = arith.constant 0 : index
    %3 = vector.load %arg1[%c0, %c0_1] : memref<16x32xf32, #tpu.memory_space<vmem>>, vector<16x32xf32>
    %4 = arith.truncf %3 : vector<16x32xf32> to vector<16x32xbf16>
    %c0_2 = arith.constant 0 : index
    %c0_3 = arith.constant 0 : index
    %5 = vector.load %arg2[%c0_2, %c0_3] : memref<32x128xf32, #tpu.memory_space<vmem>>, vector<32x128xf32>
    %6 = arith.truncf %5 : vector<32x128xf32> to vector<32x128xbf16>
    %cst = arith.constant dense<0.000000e+00> : vector<16x128xf32>
    %7 = tpu.matmul %4, %6, %cst {dimension_numbers = #tpu.dot_dimension_numbers<[1], [0], [0], [1], [0, 0, 1, 1], [], []>} : vector<16x32xbf16>, vector<32x128xbf16>, vector<16x128xf32> -> vector<16x128xf32>
    %c0_4 = arith.constant 0 : index
    %c0_5 = arith.constant 0 : index
    %8 = vector.load %arg3[%c0_4, %c0_5] : memref<1x128xf32, #tpu.memory_space<vmem>>, vector<1x128xf32>
    %9 = vector.broadcast %8 : vector<1x128xf32> to vector<16x128xf32>
    %10 = arith.addf %7, %9 : vector<16x128xf32>
    %cst_6 = arith.constant dense<0.000000e+00> : vector<128xf32>
    %11 = vector.multi_reduction <add>, %10, %cst_6 [0] : vector<16x128xf32> to vector<128xf32>
    %12 = vector.shape_cast %11 : vector<128xf32> to vector<1x128xf32>
    %cst_7 = arith.constant 6.250000e-02 : f32
    %13 = vector.broadcast %cst_7 : f32 to vector<1x128xf32>
    %14 = arith.mulf %12, %13 : vector<1x128xf32>
    %15 = arith.mulf %10, %10 : vector<16x128xf32>
    %cst_8 = arith.constant dense<0.000000e+00> : vector<128xf32>
    %16 = vector.multi_reduction <add>, %15, %cst_8 [0] : vector<16x128xf32> to vector<128xf32>
    %17 = vector.shape_cast %16 : vector<128xf32> to vector<1x128xf32>
    %cst_9 = arith.constant 6.250000e-02 : f32
    %18 = vector.broadcast %cst_9 : f32 to vector<1x128xf32>
    %19 = arith.mulf %17, %18 : vector<1x128xf32>
    %20 = arith.mulf %14, %14 : vector<1x128xf32>
    %21 = arith.subf %19, %20 : vector<1x128xf32>
    %cst_10 = arith.constant 0.000000e+00 : f32
    %22 = vector.broadcast %cst_10 : f32 to vector<1x128xf32>
    %23 = arith.maximumf %21, %22 : vector<1x128xf32>
    %c0_11 = arith.constant 0 : index
    %c0_12 = arith.constant 0 : index
    %24 = vector.load %arg4[%c0_11, %c0_12] : memref<1x128xf32, #tpu.memory_space<vmem>>, vector<1x128xf32>
    %cst_13 = arith.constant 9.99999974E-6 : f32
    %25 = vector.broadcast %cst_13 : f32 to vector<1x128xf32>
    %26 = arith.addf %23, %25 : vector<1x128xf32>
    %27 = math.rsqrt %26 : vector<1x128xf32>
    %28 = arith.mulf %24, %27 : vector<1x128xf32>
    %c0_14 = arith.constant 0 : index
    %c0_15 = arith.constant 0 : index
    %29 = vector.load %arg5[%c0_14, %c0_15] : memref<1x128xf32, #tpu.memory_space<vmem>>, vector<1x128xf32>
    %30 = arith.mulf %14, %28 : vector<1x128xf32>
    %31 = arith.subf %29, %30 : vector<1x128xf32>
    %32 = vector.broadcast %28 : vector<1x128xf32> to vector<16x128xf32>
    %33 = arith.mulf %10, %32 : vector<16x128xf32>
    %34 = vector.broadcast %31 : vector<1x128xf32> to vector<16x128xf32>
    %35 = arith.addf %33, %34 : vector<16x128xf32>
    %cst_16 = arith.constant 0.000000e+00 : f32
    %36 = vector.broadcast %cst_16 : f32 to vector<16x128xf32>
    %37 = arith.maximumf %35, %36 : vector<16x128xf32>
    %c0_17 = arith.constant 0 : index
    %c0_18 = arith.constant 0 : index
    %38 = vector.load %arg9[%c0_17, %c0_18] : memref<16x128xf32, #tpu.memory_space<vmem>>, vector<16x128xf32>
    %39 = arith.truncf %37 : vector<16x128xf32> to vector<16x128xbf16>
    %c0_19 = arith.constant 0 : index
    %c0_20 = arith.constant 0 : index
    %40 = vector.load %arg6[%c0_19, %c0_20] : memref<128x128xf32, #tpu.memory_space<vmem>>, vector<128x128xf32>
    %41 = arith.truncf %40 : vector<128x128xf32> to vector<128x128xbf16>
    %cst_21 = arith.constant dense<0.000000e+00> : vector<16x128xf32>
    %42 = tpu.matmul %39, %41, %cst_21 {dimension_numbers = #tpu.dot_dimension_numbers<[1], [0], [0], [1], [0, 0, 1, 1], [], []>} : vector<16x128xbf16>, vector<128x128xbf16>, vector<16x128xf32> -> vector<16x128xf32>
    %43 = arith.addf %38, %42 : vector<16x128xf32>
    %c0_22 = arith.constant 0 : index
    %c0_23 = arith.constant 0 : index
    %44 = vector.load %arg9[%c0_22, %c0_23] : memref<16x128xf32, #tpu.memory_space<vmem>>, vector<16x128xf32>
    tpu.vector_store %arg9[%c0_22, %c0_23], %43 {strides = array<i32>} : memref<16x128xf32, #tpu.memory_space<vmem>>, vector<16x128xf32>,
    %c1_i32 = arith.constant 1 : i32
    %45 = arith.cmpi eq, %arg0, %c1_i32 : i32
    %46 = arith.extui %45 : i1 to i32
    %c0_i32_24 = arith.constant 0 : i32
    %47 = arith.cmpi ne, %46, %c0_i32_24 : i32
    scf.if %47 {
      %c0_25 = arith.constant 0 : index
      %c0_26 = arith.constant 0 : index
      %48 = vector.load %arg9[%c0_25, %c0_26] : memref<16x128xf32, #tpu.memory_space<vmem>>, vector<16x128xf32>
      %c0_27 = arith.constant 0 : index
      %c0_28 = arith.constant 0 : index
      %49 = vector.load %arg8[%c0_27, %c0_28] : memref<16x128xf32, #tpu.memory_space<vmem>>, vector<16x128xf32>
      tpu.vector_store %arg8[%c0_27, %c0_28], %48 {strides = array<i32>} : memref<16x128xf32, #tpu.memory_space<vmem>>, vector<16x128xf32>,
    } else {
    }
    return
  }
  func.func @transform_0(%arg0: i32) -> (i32, i32) {
    %c0_i32 = arith.constant 0 : i32
    %c0_i32_0 = arith.constant 0 : i32
    %c0_i32_1 = arith.constant 0 : i32
    return %c0_i32, %c0_i32_0 : i32, i32
  }
  func.func @transform_1(%arg0: i32) -> (i32, i32) {
    %c0_i32 = arith.constant 0 : i32
    %c0_i32_0 = arith.constant 0 : i32
    return %c0_i32, %arg0 : i32, i32
  }
  func.func @transform_2(%arg0: i32) -> (i32, i32) {
    %c0_i32 = arith.constant 0 : i32
    %c0_i32_0 = arith.constant 0 : i32
    return %c0_i32, %arg0 : i32, i32
  }
  func.func @transform_3(%arg0: i32) -> (i32, i32) {
    %c0_i32 = arith.constant 0 : i32
    %c0_i32_0 = arith.constant 0 : i32
    return %c0_i32, %arg0 : i32, i32
  }
  func.func @transform_4(%arg0: i32) -> (i32, i32) {
    %c0_i32 = arith.constant 0 : i32
    %c0_i32_0 = arith.constant 0 : i32
    return %c0_i32, %arg0 : i32, i32
  }
  func.func @transform_5(%arg0: i32) -> (i32, i32) {
    %c0_i32 = arith.constant 0 : i32
    %c0_i32_0 = arith.constant 0 : i32
    return %arg0, %c0_i32 : i32, i32
  }
  func.func @transform_6(%arg0: i32) -> (i32, i32) {
    %c0_i32 = arith.constant 0 : i32
    %c0_i32_0 = arith.constant 0 : i32
    %c0_i32_1 = arith.constant 0 : i32
    return %c0_i32, %c0_i32_0 : i32, i32
  }
  func.func @transform_7(%arg0: i32) -> (i32, i32) {
    %c0_i32 = arith.constant 0 : i32
    %c0_i32_0 = arith.constant 0 : i32
    %c0_i32_1 = arith.constant 0 : i32
    return %c0_i32, %c0_i32_0 : i32, i32
  }
}

</mosaic_0001>

<bundles_post_ra>
// kernel: tpu_custom_call.1
= control target key start
LH: loop header
LB: loop body
LE: loop exit
PB: predicated region body
PF: predicated region fallthrough
CT: control target
= control target key end

     0   :  { %s1325_s0 = inlined_call_operand.hbm [shape: f32[16,32], index: 0, kind: input, shape index: {}]   ;;  %s1326_s1 = inlined_call_operand.hbm [shape: f32[32,256], index: 1, kind: input, shape index: {}]   ;;  %s1327_s2 = inlined_call_operand.hbm [shape: f32[1,256], index: 2, kind: input, shape index: {}]   ;;  %s1328_s3 = inlined_call_operand.vmem [shape: f32[1,256], index: 3, kind: input, shape index: {}]   ;;  %s1329_s4 = inlined_call_operand.hbm [shape: f32[1,256], index: 4, kind: input, shape index: {}]   ;;  %s1330_s5 = inlined_call_operand.hbm [shape: f32[256,128], index: 5, kind: input, shape index: {}]   ;;  %s1331_s6 = inlined_call_operand.vmem [shape: f32[1,128], index: 6, kind: input, shape index: {}]   ;;  %s1332_s7 = inlined_call_operand.hbm [shape: f32[16,128], index: 7, kind: output, shape index: {}]  }
   0x1   :  { %1334 = sst [smem:[#allocation17_spill]] %s1325_s0 }
   0x2   :  { %1335 = sst [smem:[#allocation18_spill]] %s1326_s1 }
   0x3   :  { %1336 = sst [smem:[#allocation19_spill]] %s1329_s4 }
   0x4   :  { %12 = vsyncpa [#allocation4], 0 }
   0x5   :  { %13 = vsyncpa [#allocation7], 0 }
   0x6   :  { %15 = vsyncpa [#allocation7 + $0x1], 0 }
   0x7   :  { %16 = vsyncpa [#allocation10], 0 }
   0x8   :  { %18 = vsyncpa [#allocation10 + $0x1], 0 }
   0x9   :  { %19 = vsyncpa [#allocation5], 0  ;;  %s1080_s24 = smov 0   ;;  %s1082_s25 = smov 0  }
   0xa   :  { %s1084_s26 = smov 0   ;;  %s1086_s27 = smov 0  }
   0xb LB: > { %s1101_s28 = sadd.s32 1, %s1031_s27   ;;  %s53_s29 = sadd.s32 1, %s1027_s26  ;;  %s1031_s27 = sphi %s1086_s27, %s1347_s27   ;;  %s1027_s26 = sphi %s1084_s26, %s1346_s26   ;;  %s1023_s25 = sphi %s1082_s25, %s1345_s25   ;;  %s1019_s24 = sphi %s1080_s24, %s1344_s24  }
   0xc   : > { %s50_s30 = ssub.s32 %s1031_s27, %s1101_s28  ;;  %p60_p0 = scmp.ne.s32.totalorder %s1027_s26, %s1023_s25 }
   0xd   : > { %p51_p1 = scmp.eq.s32.totalorder %s50_s30, 0  ;;  %p61_p2 = scmp.eq.s32.totalorder %s1031_s27, 0 }
   0xe   : > { %p760_p4 = scmp.lt.s32.totalorder %s1031_s27, 2  ;;  %s253_s9 = sand.u32 1, %s1031_s27  }
   0xf   : > { %s1110_s8 = scalar_select %p51_p1, %s1027_s26, %s53_s29  }
  0x10   : > { %p62_p3 = por %p61_p2, %p60_p0  ;;  %s1115_s10 = sand.u32 1, %s1027_s26  }
  0x11   : > { %s709_s11 = sshll.u32 %s1115_s10, 5  ;;  %s710_s12 = sshll.u32 %s1031_s27, 3 }
  0x12   : > { %s1337_s1 = sld [smem:[#allocation18_spill]]  ;;  %s257_s17 = scalar_lea.vmem [#allocation6], %s709_s11 }
  0x13   : > { %s264_s18 = sshll.u32 %s257_s17, 4  ;;  %p1122_p5 = pnand %p760_p4, %p62_p3  ;;  %s265_s18 = int_to_ptr.vmem [resolvable:$true] %s264_s18 }
  0x14   : > { %s1339_s4 = sld [smem:[#allocation19_spill]]  ;;  %s1132_s23 = scalar_lea.sflag [#allocation7], %s253_s9 }
  0x15   : > { %p811_p7 = pneg %p1122_p5 }
  0x18   : > { %s261_s15 = scalar_lea.hbm %s1337_s1, %s710_s12  ;;  %s814_s13 = scalar_lea.hbm %s1337_s1, 64 }
  0x19   : > { %s262_s16 = sshll.u32 %s261_s15, 4  ;;  %s263_s16 = int_to_ptr.hbm [resolvable:$true] %s262_s16 }
  0x1a   : > { %s303_s22 = scalar_lea.hbm %s1339_s4, %s1031_s27  ;;  %s807_s29 = sshra.s32 %s263_s16, 4  ;;  %s808_s29 = int_to_ptr.hbm [resolvable:$true] %s807_s29 }
  0x1b   : > { %s809_s30 = scalar_lea.hbm %s808_s29, 32  ;;  %p815_p10 = scmp.lt.s32.totalorder %s808_s29, %s1337_s1 }
  0x1c   : > { %p810_p6 = scmp.ne.s32.totalorder %s808_s29, %s809_s30  ;;  %p816_p11 = scmp.lt.s32.totalorder %s814_s13, %s809_s30 }
  0x1e   : > { %p812_p8 = pnand %p811_p7, %p810_p6  ;;  %p817_p12 = por %p816_p11, %p815_p10 }
  0x20   : > { %p813_p9 = pneg %p812_p8 }
  0x22   : > { %p818_p13 = pnand %p817_p12, %p813_p9 }
  0x24   : > { %821 = shalt.err (!%p818_p13)
}
  0x25   : > { %s1033_s17 = smov 256   ;;  %s1333_s20 = smov 128  }
  0x26   : > { %s1035_s21 = smov 8   ;;  %s305_s11 = sshll.u32 %s303_s22, 4  ;;  %s306_s11 = int_to_ptr.hbm [resolvable:$true] %s305_s11 }
  0x27   : > { %749 = dma.hbm_to_vmem [thread:$0]  (!%p1122_p5), %s263_s16, 512, %s265_s18, %s1132_s23, %s1033_s17, %s1333_s20, %s1035_s21  }
  0x28   : > { %s300_s12 = scalar_lea.vmem [#allocation9], %s1115_s10  ;;  %s1153_s29 = scalar_lea.sflag [#allocation10], %s253_s9 }
  0x29   : > { %s307_s14 = sshll.u32 %s300_s12, 4  ;;  %s837_s30 = sshra.s32 %s306_s11, 4  ;;  %s308_s14 = int_to_ptr.vmem [resolvable:$true] %s307_s14  ;;  %s838_s30 = int_to_ptr.hbm [resolvable:$true] %s837_s30 }
  0x2a   : > { %s839_s13 = scalar_lea.hbm %s838_s30, 1  ;;  %s844_s16 = scalar_lea.hbm %s1339_s4, 2 }
  0x2b   : > { %p840_p0 = scmp.ne.s32.totalorder %s838_s30, %s839_s13  ;;  %p845_p3 = scmp.lt.s32.totalorder %s838_s30, %s1339_s4 }
  0x2c   : > { %p846_p4 = scmp.lt.s32.totalorder %s844_s16, %s839_s13 }
  0x2d   : > { %p842_p1 = pnand %p840_p0, %p811_p7 }
  0x2e   : > { %p847_p6 = por %p846_p4, %p845_p3 }
  0x2f   : > { %p843_p2 = pneg %p842_p1 }
  0x31   : > { %p848_p8 = pnand %p847_p6, %p843_p2 }
  0x33   : > { %851 = shalt.err (!%p848_p8)
}
  0x34   : > { %755 = dma.hbm_to_vmem [thread:$0]  (!%p1122_p5), %s306_s11, 16, %s308_s14, %s1153_s29  }
  0x35   : > { %s1168_s1 = sadd.s32 4294967295, %s1031_s27   ;;  %p66_p10 = scmp.ne.s32.totalorder %s1023_s25, %s1019_s24 }
  0x36   : > { %p67_p9 = scmp.eq.s32.totalorder %s1168_s1, 0  ;;  %p706_p11 = scmp.ge.s32.totalorder %s1031_s27, 1 }
  0x37   : > { %p223_p12 = scmp.lt.s32.totalorder %s1031_s27, 3  ;;  %p707_p13 = scmp.ne.s32.totalorder %s1168_s1, 0 }
  0x38   : > { %p1178_p0 = por %p67_p9, %p66_p10  ;;  %s1341_s0 = sld [smem:[#allocation17_spill]] }
  0x39   : > { %p1185_p1 = pnand %p706_p11, %p223_p12  ;;  %s1036_s24 = smov [#allocation3]  }
  0x3a   : > { %s236_s30 = sshll.u32 %s1036_s24, 4  ;;  %s280_s16 = scalar_lea.hbm %s1327_s2, %s1031_s27  ;;  %s237_s30 = int_to_ptr.vmem [resolvable:$true] %s236_s30 }
  0x3b   : > { %p742_p2 = pneg %p1185_p1  ;;  %s282_s18 = sshll.u32 %s280_s16, 4  ;;  %s283_s18 = int_to_ptr.hbm [resolvable:$true] %s282_s18 }
  0x3c   : > { %s277_s22 = scalar_lea.vmem [#allocation8], %s1115_s10  ;;  %s897_s12 = sshra.s32 %s283_s18, 4  ;;  %s898_s12 = int_to_ptr.hbm [resolvable:$true] %s897_s12 }
  0x3d   : > { %p743_p3 = pnand %p742_p2, %p67_p9  ;;  %s284_s17 = sshll.u32 %s277_s22, 4  ;;  %s285_s17 = int_to_ptr.vmem [resolvable:$true] %s284_s17 }
  0x3e   : > { %s234_s11 = sshll.u32 %s1341_s0, 4  ;;  %s899_s0 = scalar_lea.hbm %s898_s12, 1  ;;  %s235_s11 = int_to_ptr.hbm [resolvable:$true] %s234_s11 }
  0x3f   : > { %745 = dma.hbm_to_vmem [thread:$0]  (!%p743_p3), %s235_s11, 256, %s237_s30, [#allocation4], %s1333_s20, %s1333_s20, %s1035_s21  }
  0x40   : > { %p900_p4 = scmp.ne.s32.totalorder %s898_s12, %s899_s0  ;;  %s904_s15 = scalar_lea.hbm %s1327_s2, 2 }
  0x41   : > { %p905_p10 = scmp.lt.s32.totalorder %s898_s12, %s1327_s2  ;;  %p906_p11 = scmp.lt.s32.totalorder %s904_s15, %s899_s0 }
  0x42   : > { %p902_p6 = pnand %p900_p4, %p811_p7 }
  0x43   : > { %p907_p12 = por %p906_p11, %p905_p10 }
  0x44   : > { %p903_p8 = pneg %p902_p6 }
  0x46   : > { %p908_p2 = pnand %p907_p12, %p903_p8 }
  0x48   : > { %911 = shalt.err (!%p908_p2)
}
  0x49   : > { %752 = dma.hbm_to_vmem [thread:$0]  (!%p1122_p5), %s283_s18, 16, %s285_s17, %s1132_s23  }
  0x4a   : > { %s711_s11 = sshll.u32 %s1115_s10, 7  ;;  %s725_s30 = sshll.u32 %s1031_s27, 7 }
  0x4b   : > { %s323_s13 = scalar_lea.hbm %s1330_s5, %s725_s30  ;;  %s318_s4 = scalar_lea.vmem [#allocation11], %s711_s11 }
  0x4c   : > { %s324_s20 = sshll.u32 %s323_s13, 4  ;;  %s326_s12 = sshll.u32 %s318_s4, 4  ;;  %s325_s20 = int_to_ptr.hbm [resolvable:$true] %s324_s20  ;;  %s327_s12 = int_to_ptr.vmem [resolvable:$true] %s326_s12 }
  0x4d   : > { %s927_s0 = sshra.s32 %s325_s20, 4  ;;  %s934_s27 = scalar_lea.hbm %s1330_s5, 256  ;;  %s928_s0 = int_to_ptr.hbm [resolvable:$true] %s927_s0 }
  0x4e   : > { %s929_s15 = scalar_lea.hbm %s928_s0, 128  ;;  %p935_p8 = scmp.lt.s32.totalorder %s928_s0, %s1330_s5 }
  0x4f   : > { %p930_p3 = scmp.ne.s32.totalorder %s928_s0, %s929_s15  ;;  %p936_p10 = scmp.lt.s32.totalorder %s934_s27, %s929_s15 }
  0x51   : > { %p932_p4 = pnand %p930_p3, %p811_p7  ;;  %p937_p11 = por %p936_p10, %p935_p8 }
  0x53   : > { %p933_p6 = pneg %p932_p4 }
  0x55   : > { %p938_p12 = pnand %p937_p11, %p933_p6 }
  0x57   : > { %941 = shalt.err (!%p938_p12)
}
  0x58   : > { %s1343_s16 = smov 128   ;;  %338 = sbr.rel (%p1185_p1) target bundleno = 463 (0x1cf), region = 48 }
  0x59   : > { %758 = dma.hbm_to_vmem [thread:$0]  (!%p1122_p5), %s325_s20, 2048, %s327_s12, %s1153_s29, %s1343_s16, %s1343_s16, %s1035_s21  }
  0x5d   : > { %1002 = dma.done.wait (%p67_p9), [#allocation4], 256  }
  0x5e   : > { %1004 = vsyncadd (%p67_p9), [#allocation4], 4294967040  ;;  %s345_s11 = sand.u32 1, %s1168_s1   ;;  %s1241_s30 = sand.u32 1, %s1023_s25  }
  0x5f   : > { %s716_s19 = sshll.u32 %s1241_s30, 5  ;;  %s346_s22 = scalar_lea.sflag [#allocation7], %s345_s11 }
  0x60   : > { %s349_s24 = scalar_lea.vmem [#allocation6], %s716_s19 }
  0x61   : > { %1006 = dma.done.wait (%p1178_p0), %s346_s22, 528  }
  0x62   : > { %1008 = vsyncadd (%p1178_p0), %s346_s22, 4294966768  ;;  %s358_s20 = scalar_lea.vmem [#allocation8], %s1241_s30  ;;  %s365_s21 = scalar_lea.sflag [#allocation10], %s345_s11 }
  0x63   : > { %s367_s29 = scalar_lea.vmem [#allocation9], %s1241_s30 }
  0x64   : > { %1010 = dma.done.wait (%p1178_p0), %s365_s21, 2064  }
  0x65   : > { %1012 = vsyncadd (%p1178_p0), %s365_s21, 4294965232  ;;  %s717_s14 = sshll.u32 %s1241_s30, 7  ;;  %p420_p5 = scmp.lt.s32.totalorder %s1168_s1, 1 }
  0x66   : > { %s1263_s15 = scalar_lea.vmem [#allocation11], %s717_s14  ;;  %428 = sbr.rel (%p707_p13) target bundleno = 110 (0x6e), region = 72 }
  0x67   : > { %s1257_s13 = scalar_select %p420_p5, %s1168_s1, 1 }
  0x69   : > { %s422_s0 = scalar_lea.vmem %s1328_s3, %s1257_s13 }
  0x6b   : > { %v803_v0 = vld [vmem:[%s1331_s6] ss:$0 sm:$0xff] }
  0x6c   : > { %433 = vst [vmem:[#allocation2] sm:$0xff] %v803_v0 }
  0x6d   : > { %434 = vst [vmem:[#allocation2 + $0x8] sm:$0xff] %v803_v0 }
  0x6e PF: > { %v440_v1 = vld [vmem:[%s349_s24 + $0x10] sm:$0xff]  ;;  %v441_v2 = vld [vmem:[%s349_s24 + $0x18] sm:$0xff]  ;;  %v438_v3 = vld [vmem:[%s349_s24] sm:$0xff]  ;;  %vm448_vm0 = vcmask 261120   ;;  %p720_p7 = scmp.ne.s32.totalorder %s1168_s1, 1 }
  0x6f   : > { %v443_v4 = vpack.c.bf16 %v441_v2, %v440_v1  ;;  %v439_v5 = vld [vmem:[%s349_s24 + $0x8] sm:$0xff]  ;;  %v435_v7 = vld [vmem:[#allocation3] sm:$0xff]  ;;  %v436_v8 = vld [vmem:[#allocation3 + $0x8] sm:$0xff] }
  0x70   : > { %v442_v6 = vpack.c.bf16 %v439_v5, %v438_v3  ;;  %v437_v9 = vpack.c.bf16 %v436_v8, %v435_v7  ;;  %v532_v11 = vld [vmem:[%s1263_s15 + $0x70] sm:$0xff]  ;;  %v533_v12 = vld [vmem:[%s1263_s15 + $0x78] sm:$0xff]  ;;  %v530_v15 = vld [vmem:[%s1263_s15 + $0x60] sm:$0xff] }
  0x71   : > { %458 = vmatpush.bf16.msra.mxu0 %v443_v4  ;;  %v541_v13 = vpack.c.bf16 %v533_v12, %v532_v11  ;;  %v804_v14 = vld [vmem:[%s358_s20] ss:$0 sm:$0xff]  ;;  %v531_v16 = vld [vmem:[%s1263_s15 + $0x68] sm:$0xff]  ;;  %v528_v21 = vld [vmem:[%s1263_s15 + $0x50] sm:$0xff] }
  0x72   : > { %v540_v17 = vpack.c.bf16 %v531_v16, %v530_v15  ;;  %v529_v22 = vld [vmem:[%s1263_s15 + $0x58] sm:$0xff]  ;;  %v526_v29 = vld [vmem:[%s1263_s15 + $0x40] sm:$0xff]  ;;  %v527_v30 = vld [vmem:[%s1263_s15 + $0x48] sm:$0xff] }
  0x73   : > { %542 = vmatpush.bf16.msra.mxu1 %v541_v13  ;;  %v539_v23 = vpack.c.bf16 %v529_v22, %v528_v21  ;;  %v538_v31 = vpack.c.bf16 %v527_v30, %v526_v29  ;;  %v524_v36 = vld [vmem:[%s1263_s15 + $0x30] sm:$0xff]  ;;  %v525_v37 = vld [vmem:[%s1263_s15 + $0x38] sm:$0xff]  ;;  %v522_v43 = vld [vmem:[%s1263_s15 + $0x20] sm:$0xff] }
  0x74   : > { %v537_v38 = vpack.c.bf16 %v525_v37, %v524_v36  ;;  %v523_v44 = vld [vmem:[%s1263_s15 + $0x28] sm:$0xff]  ;;  %v520_v50 = vld [vmem:[%s1263_s15 + $0x10] sm:$0xff]  ;;  %v521_v51 = vld [vmem:[%s1263_s15 + $0x18] sm:$0xff] }
  0x75   : > { %459 = vmatpush.bf16.msra.mxu0 %v442_v6  ;;  %v536_v45 = vpack.c.bf16 %v523_v44, %v522_v43  ;;  %v518_v52 = vld [vmem:[%s1263_s15] sm:$0xff]  ;;  %v535_v53 = vpack.c.bf16 %v521_v51, %v520_v50  ;;  %v519_v54 = vld [vmem:[%s1263_s15 + $0x8] sm:$0xff]  ;;  %v487_v2 = vld [vmem:[%s422_s0] sm:$0x1] }
  0x76   : > { %v534_v57 = vpack.c.bf16 %v519_v54, %v518_v52  ;;  %v500_v6 = vld [vmem:[%s367_s29] sm:$0x1] }
  0x77   : > { %543 = vmatpush.bf16.msra.mxu1 %v540_v17 }
  0x78   : > { %719 = vmatmul.msk.bf16.vlgmr.msra.gmra.mxu0 %vm448_vm0, %v437_v9 }
  0x7b   : > { %544 = vmatpush.bf16.msra.mxu1 %v539_v23  ;;  %v516_v23 = vld [vmem:[#allocation2 + $0x8] sm:$0xff] }
  0x7f   : > { %545 = vmatpush.bf16.msra.mxu1 %v538_v31 }
  0x83   : > { %546 = vmatpush.bf16.msra.mxu1 %v537_v38 }
  0x87   : > { %547 = vmatpush.bf16.msra.mxu1 %v536_v45 }
  0x8b   : > { %548 = vmatpush.bf16.msra.mxu1 %v535_v53 }
  0x8f   : > { %549 = vmatpush.bf16.msra.mxu1 %v534_v57 }
  0xf5   : > { %v461_v10 = vpop.f32.mrf.mxu0 }
  0xf6   : > { %v1276_v18 = vadd.f32 %v804_v14, %v461_v10 }
  0xf8   : > { %v474_v24 = vmul.f32 %v1276_v18, %v1276_v18 }
  0xfd   : > { %v463_v19 = vpop.f32.mrf.mxu0 }
  0xfe   : > { %v1278_v20 = vadd.f32 %v804_v14, %v463_v19  ;;  %v515_v19 = vld [vmem:[#allocation2] sm:$0xff] }
 0x100   : > { %v466_v25 = vadd.f32 %v1278_v20, %v1276_v18  ;;  %v475_v26 = vmul.f32 %v1278_v20, %v1278_v20 }
 0x102   : > { %v467_v27 = vrot.slane %v466_v25, 4  ;;  %v476_v28 = vadd.f32 %v475_v26, %v474_v24 }
 0x104   : > { %v468_v32 = vadd.f32 %v467_v27, %v466_v25  ;;  %v477_v33 = vrot.slane %v476_v28, 4 }
 0x106   : > { %v469_v34 = vrot.slane %v468_v32, 2  ;;  %v478_v35 = vadd.f32 %v477_v33, %v476_v28 }
 0x108   : > { %v470_v39 = vadd.f32 %v469_v34, %v468_v32  ;;  %v479_v40 = vrot.slane %v478_v35, 2 }
 0x10a   : > { %v471_v41 = vrot.slane %v470_v39, 1  ;;  %v480_v42 = vadd.f32 %v479_v40, %v478_v35 }
 0x10c   : > { %v472_v46 = vadd.f32 %v471_v41, %v470_v39  ;;  %v481_v47 = vrot.slane %v480_v42, 1 }
 0x10e   : > { %v473_v48 = vmul.f32 0.0625, %v472_v46  ;;  %v482_v49 = vadd.f32 %v481_v47, %v480_v42 }
 0x110   : > { %v483_v55 = vmul.f32 0.0625, %v482_v49  ;;  %v484_v56 = vmul.f32 %v473_v48, %v473_v48 }
 0x112   : > { %v485_v58 = vsub.f32 %v483_v55, %v484_v56 }
 0x114   : > { %v486_v59 = vmax.f32 %v485_v58, 0.0 }
 0x116   : > { %v488_v60 = vadd.f32 1e-05, %v486_v59 }
 0x118   : > { %805 = vrsqrt.f32 %v488_v60  ;;  %vm495_vm2 = vweird.f32 %v488_v60 }
 0x11e   : > { %v806_v61 = vpop.eup %805 }
 0x11f   : > { %v490_v62 = vmul.f32 %v806_v61, %v488_v60  ;;  %vm496_vm1 = vweird.f32 %v806_v61 }
 0x120   : > { %vm497_vm3 = vmor %vm495_vm2, %vm496_vm1 }
 0x121   : > { %v491_v63 = vmul.f32 %v806_v61, %v490_v62 }
 0x123   : > { %v492_v0 = vmul.f32 0.5, %v491_v63 }
 0x125   : > { %v493_v1 = vsub.f32 1.5, %v492_v0 }
 0x127   : > { %v494_v3 = vmul.f32 %v806_v61, %v493_v1 }
 0x129   : > { %v498_v4 = vsel %vm497_vm3, %v806_v61, %v494_v3 }
 0x12a   : > { %v499_v5 = vmul.f32 %v498_v4, %v487_v2 }
 0x12c   : > { %v504_v7 = vperm.slane %v499_v5, 0  ;;  %v501_v8 = vmul.f32 %v499_v5, %v473_v48 }
 0x12e   : > { %v502_v9 = vsub.f32 %v500_v6, %v501_v8  ;;  %v507_v10 = vmul.f32 %v504_v7, %v1278_v20  ;;  %v506_v11 = vmul.f32 %v504_v7, %v1276_v18 }
 0x130   : > { %v509_v12 = vperm.slane %v502_v9, 0 }
 0x132   : > { %v511_v13 = vadd.f32 %v509_v12, %v506_v11  ;;  %v512_v14 = vadd.f32 %v509_v12, %v507_v10 }
 0x134   : > { %v513_v15 = vmax.f32 %v511_v13, 0.0  ;;  %v514_v16 = vmax.f32 %v512_v14, 0.0 }
 0x136   : > { %v517_v17 = vpack.c.bf16 %v514_v16, %v513_v15 }
 0x138   : > { %550 = vmatmul.bf16.vlgmr.msra.gmra.mxu1 %v517_v17 }
 0x1b5   : > { %v551_v21 = vpop.f32.mrf.mxu1 }
 0x1b6   : > { %v556_v22 = vadd.f32 %v551_v21, %v515_v19 }
 0x1b8   : > { %558 = vst [vmem:[#allocation2] sm:$0xff] %v556_v22 }
 0x1bc   : > { %563 = sbr.rel (%p720_p7) target bundleno = 457 (0x1c9), region = 76 }
 0x1bd   : > { %v553_v24 = vpop.f32.mrf.mxu1 }
 0x1be   : > { %v557_v25 = vadd.f32 %v553_v24, %v516_v23 }
 0x1c0   : > { %559 = vst [vmem:[#allocation2 + $0x8] sm:$0xff] %v557_v25 }
 0x1c1   : > { %v564_v20 = vld [vmem:[#allocation2] sm:$0xff] }
 0x1c2   : > { %566 = vst [vmem:[#allocation12] sm:$0xff] %v564_v20 }
 0x1c7   : > { %v565_v18 = vld [vmem:[#allocation2 + $0x8] sm:$0xff] }
 0x1c8   : > { %567 = vst [vmem:[#allocation12 + $0x8] sm:$0xff] %v565_v18 }
 0x1c9 PF: > { %p762_p9 = scmp.eq.s32.totalorder %s1168_s1, 1  ;;  %s1037_s18 = smov [#allocation12]  }
 0x1ca   : > { %s573_s17 = sshll.u32 %s1037_s18, 4  ;;  %s575_s30 = sshll.u32 %s1332_s7, 4  ;;  %s574_s17 = int_to_ptr.vmem [resolvable:$true] %s573_s17  ;;  %s576_s30 = int_to_ptr.hbm [resolvable:$true] %s575_s30 }
 0x1cb   : > { %s1038_s19 = smov 128   ;;  %s1039_s22 = smov 8  }
 0x1cc   : > { %739 = dma.vmem_to_hbm [thread:$0]  (%p762_p9), %s574_s17, 256, %s576_s30, [#allocation5], %s1038_s19, %s1038_s19, %s1039_s22  }
 0x1cd   : > { %1014 = dma.done.wait (%p762_p9), [#allocation5], 256  }
 0x1ce   : > { %1016 = vsyncadd (%p762_p9), [#allocation5], 4294967040 }
 0x1cf PF: > { %p22_p13 = scmp.ge.s32.totalorder %s1101_s28, 4   ;;  %s1344_s24 = smov %s1023_s25 }
 0x1d0   : > { %s1345_s25 = smov %s1027_s26  ;;  %s1346_s26 = smov %s1110_s8 }
 0x1d1   : > { %s1347_s27 = smov %s1101_s28  ;;  %24 = sbr.rel (!%p22_p13) target bundleno = 11 (0xb), region = 136 }
 0x1d6   :  { %592 = vsyncpa [#allocation4], 1 }
 0x1d7   :  { %594 = vsyncpa [#allocation4 + $0x1], 1 }
 0x1d8   :  { %595 = vsyncpa [#allocation7], 1 }
 0x1d9   :  { %597 = vsyncpa [#allocation7 + $0x1], 1 }
 0x1da   :  { %598 = vsyncpa [#allocation10], 1 }
 0x1db   :  { %600 = vsyncpa [#allocation10 + $0x1], 1 }
 0x1dc   :  { %601 = vsyncpa [#allocation5], 1 }
 0x1dd   :  { %603 = vsyncpa [#allocation5 + $0x1], 1 }

</bundles_post_ra>
